<compile_context>
chip_gen: v7x
topology: tpu7x:2x2x1
jax: 0.10.0
libtpu: 0.0.40
codegen_flags: <defaults>
</compile_context>

<pallas_src>
import functools

import jax
import jax.numpy as jnp
from jax.experimental import pallas as pl
from jax.experimental.pallas import tpu as pltpu


def _round_up(x, m):
    return ((x + m - 1) // m) * m


def mlp_kernel(x_ref, w1_ref, b1_ref, w2_ref, b2_ref, w3_ref, b3_ref, o_ref,
               *, approx_recip):
    cd = w1_ref.dtype  # MXU operand dtype (bf16 fast path or f32 exact path)

    # x arrives f32 from HBM; cast to the compute dtype on the VPU (free vs. an extra
    # wrapper-side XLA cast pass over x).
    x = x_ref[...].astype(cd)

    # hidden layer 1: tanh(x @ W1 + b1)   (f32 accumulate, f32 bias/tanh)
    h = jnp.tanh(
        jnp.dot(x, w1_ref[...], preferred_element_type=jnp.float32) + b1_ref[...]
    )
    # hidden layer 2: tanh(h @ W2 + b2)
    h = jnp.tanh(
        jnp.dot(h.astype(cd), w2_ref[...], preferred_element_type=jnp.float32)
        + b2_ref[...]
    )
    # output layer logits (padded columns carry a -1e30 bias -> exp() == 0)
    logits = (
        jnp.dot(h.astype(cd), w3_ref[...], preferred_element_type=jnp.float32)
        + b3_ref[...]
    )

    # softmax over dim=1 (feature axis), numerically stabilized, in f32.
    m = jnp.max(logits, axis=1, keepdims=True)
    e = jnp.exp(logits - m)
    denom = jnp.sum(e, axis=1, keepdims=True)
    # fast path: approx reciprocal runs on the otherwise-idle EUP slot; exact path keeps
    # approx=False so the f32 verification tolerance (1e-5) holds.
    o_ref[...] = (e * pl.reciprocal(denom, approx=approx_recip)).astype(o_ref.dtype)


def extended_model_forward(x, params, *, batch_tile=1024, use_bf16=True,
                           out_dtype=None):
    """x: [B, inputdim] f32; params: dict of W1,b1,W2,b2,W3,b3 in [in,out]/[1,out] layout."""
    B, d_in = x.shape
    w1, b1 = params["w1"], params["b1"]
    w2, b2 = params["w2"], params["b2"]
    w3, b3 = params["w3"], params["b3"]
    h1 = w1.shape[1]
    h2 = w2.shape[1]
    d_out = w3.shape[1]

    # ---- batch tile selection -------------------------------------------------------
    # Large tiles (default 1024) to amortize per-step overhead; aligned to 16 sublanes
    # (bf16 packing of the in-kernel cast); never larger than needed for the batch.
    align = 16
    tile = min(int(batch_tile), _round_up(B, align))
    # v7x: guarantee >= 2 grid steps for medium/large batches so the "parallel" batch
    # axis can shard across both TensorCores (harmless on single-TC v5e/v6e).
    if B >= 256:
        tile = min(tile, _round_up(-(-B // 2), align))
    tile = max(align, _round_up(tile, align))
    grid = (pl.cdiv(B, tile),)  # ragged tail handled by OOB block, no wrapper pad

    # ---- lane-dense output: pad the output feature dim to a multiple of 128 lanes ----
    d_out_p = max(128, _round_up(d_out, 128))

    compute_dtype = jnp.bfloat16 if use_bf16 else jnp.float32
    if out_dtype is None:
        # bf16 output on the fast path halves HBM writeback of the (lane-padded) result.
        out_dtype = jnp.bfloat16 if use_bf16 else jnp.float32

    # x stays f32 at the boundary (cast happens inside the kernel).
    w1c = w1.astype(compute_dtype)
    w2c = w2.astype(compute_dtype)
    w3c = jnp.pad(w3, ((0, 0), (0, d_out_p - d_out))).astype(compute_dtype)
    b1c = b1.astype(jnp.float32)
    b2c = b2.astype(jnp.float32)
    # padded logit columns get a huge negative bias -> exp() underflows to 0,
    # so the softmax denominator over the real columns is unchanged.
    b3c = jnp.pad(
        b3.astype(jnp.float32), ((0, 0), (0, d_out_p - d_out)), constant_values=-1e30
    )

    # Weights/biases: full-array blocks with constant index maps -> resident in VMEM,
    # never re-fetched across grid steps (only the x / output tiles are pipelined).
    resident = lambda shape: pl.BlockSpec(shape, lambda i: (0, 0))

    kernel = functools.partial(mlp_kernel, approx_recip=bool(use_bf16))

    out = pl.pallas_call(
        kernel,
        out_shape=jax.ShapeDtypeStruct((B, d_out_p), out_dtype),
        grid_spec=pltpu.PrefetchScalarGridSpec(
            num_scalar_prefetch=0,
            grid=grid,
            in_specs=[
                pl.BlockSpec((tile, d_in), lambda i: (i, 0)),      # x tile (pipelined)
                resident((d_in, h1)), resident((1, h1)),           # W1, b1
                resident((h1, h2)), resident((1, h2)),             # W2, b2
                resident((h2, d_out_p)), resident((1, d_out_p)),   # W3, b3 (lane-padded)
            ],
            out_specs=pl.BlockSpec((tile, d_out_p), lambda i: (i, 0)),
        ),
        compiler_params=pltpu.CompilerParams(
            dimension_semantics=("parallel",),  # shards the batch grid over v7x's 2 TCs
        ),
    )(x, w1c, b1c, w2c, b2c, w3c, b3c)

    # Invariant: any out-of-bounds tail rows read undefined data, but softmax is strictly
    # row-wise and Pallas drops OOB output rows, so real rows are never contaminated.
    return out[:, :d_out]


def init_params(key, inputdim, hiddenlayers, outputdim):
    """Deterministic init mirroring nn.Linear's U(-1/sqrt(fan_in), 1/sqrt(fan_in))."""
    dims = [inputdim] + list(hiddenlayers) + [outputdim]
    params = {}
    keys = jax.random.split(key, 2 * (len(dims) - 1))
    for li in range(len(dims) - 1):
        fan_in, fan_out = dims[li], dims[li + 1]
        bound = 1.0 / jnp.sqrt(fan_in)
        w = jax.random.uniform(
            keys[2 * li], (fan_in, fan_out), jnp.float32, -bound, bound
        )
        b = jax.random.uniform(
            keys[2 * li + 1], (1, fan_out), jnp.float32, -bound, bound
        )
        params[f"w{li + 1}"] = w
        params[f"b{li + 1}"] = b
    return params


def reference_forward(x, params, compute_dtype=jnp.float32):
    cd = compute_dtype
    h = jnp.tanh(
        jnp.dot(x.astype(cd), params["w1"].astype(cd),
                preferred_element_type=jnp.float32) + params["b1"]
    )
    h = jnp.tanh(
        jnp.dot(h.astype(cd), params["w2"].astype(cd),
                preferred_element_type=jnp.float32) + params["b2"]
    )
    logits = (
        jnp.dot(h.astype(cd), params["w3"].astype(cd),
                preferred_element_type=jnp.float32) + params["b3"]
    )
    return jax.nn.softmax(logits, axis=1)


if __name__ == "__main__":
    # Small shapes consistent with the module's forward:
    #   inputdim=32, hiddenlayers=[32, 32], outputdim=16, batch=16
    key = jax.random.PRNGKey(0)
    k_x, k_p = jax.random.split(key)

    B, inputdim, hiddenlayers, outputdim = 16, 32, [32, 32], 16
    x = jax.random.normal(k_x, (B, inputdim), jnp.float32)
    params = init_params(k_p, inputdim, hiddenlayers, outputdim)

    y_ref_f32 = reference_forward(x, params, compute_dtype=jnp.float32)
    y_ref_bf16 = reference_forward(x, params, compute_dtype=jnp.bfloat16)

    # 1) fast path: f32 x at the boundary, bf16 weights/MXU, f32 accum, bf16 output,
    #    approx reciprocal (tolerances relaxed accordingly).
    y = jax.block_until_ready(extended_model_forward(x, params))
    assert y.shape == (B, outputdim)
    yf = y.astype(jnp.float32)
    assert jnp.allclose(jnp.sum(yf, axis=1), 1.0, atol=1e-2)
    assert jnp.allclose(yf, y_ref_bf16, atol=1e-2, rtol=1e-2)
    assert jnp.allclose(yf, y_ref_f32, atol=3e-2, rtol=3e-2)

    # 2) exact f32 path: f32 everywhere, exact reciprocal, tight match to the reference.
    y32 = jax.block_until_ready(extended_model_forward(x, params, use_bf16=False))
    assert y32.dtype == jnp.float32
    assert jnp.allclose(jnp.sum(y32, axis=1), 1.0, atol=1e-5)
    assert jnp.allclose(y32, y_ref_f32, atol=1e-5, rtol=1e-5)

    # 3) ragged batch: cdiv grid with an out-of-bounds tail block (no wrapper pad).
    x_ragged = jax.random.normal(k_x, (13, inputdim), jnp.float32)
    yr = jax.block_until_ready(
        extended_model_forward(x_ragged, params, use_bf16=False)
    )
    assert yr.shape == (13, outputdim)
    assert jnp.allclose(yr, reference_forward(x_ragged, params), atol=1e-5, rtol=1e-5)

    # 4) medium batch: exercises the >=2-grid-step cap (v7x dual-TC path), exact f32.
    x_med = jax.random.normal(k_x, (384, inputdim), jnp.float32)
    ym = jax.block_until_ready(
        extended_model_forward(x_med, params, use_bf16=False)
    )
    assert ym.shape == (384, outputdim)
    assert jnp.allclose(ym, reference_forward(x_med, params), atol=1e-5, rtol=1e-5)

    # TODO(synk): LossFunction.crossentropy (training-time CE loss + L2 reg) and the
    # setparams/getflatparams host-side parameter-flattening utilities are not part of
    # forward(); intentionally not implemented in the kernel.
    print("KERNEL_OK")
</pallas_src>

<mosaic_0001>
module attributes {stable_mosaic.version = 11 : i64} {
  func.func @mlp_kernel(%arg0: i32, %arg1: memref<16x32xf32, #tpu.memory_space<vmem>>, %arg2: memref<32x32xbf16, #tpu.memory_space<vmem>>, %arg3: memref<1x32xf32, #tpu.memory_space<vmem>>, %arg4: memref<32x32xbf16, #tpu.memory_space<vmem>>, %arg5: memref<1x32xf32, #tpu.memory_space<vmem>>, %arg6: memref<32x128xbf16, #tpu.memory_space<vmem>>, %arg7: memref<1x128xf32, #tpu.memory_space<vmem>>, %arg8: memref<16x128xbf16, #tpu.memory_space<vmem>>) attributes {dimension_semantics = [#tpu.dimension_semantics<parallel>], iteration_bounds = array<i64: 1>, scalar_prefetch = 0 : i64, scratch_operands = 0 : i64, tpu.core_type = #tpu.core_type<tc>, window_params = [{transform_indices = @transform_0, window_bounds = array<i64: 16, 32>}, {pipeline_mode = #tpu.pipeline_mode<synchronous>, transform_indices = @transform_1, window_bounds = array<i64: 32, 32>}, {pipeline_mode = #tpu.pipeline_mode<synchronous>, transform_indices = @transform_2, window_bounds = array<i64: 1, 32>}, {pipeline_mode = #tpu.pipeline_mode<synchronous>, transform_indices = @transform_3, window_bounds = array<i64: 32, 32>}, {pipeline_mode = #tpu.pipeline_mode<synchronous>, transform_indices = @transform_4, window_bounds = array<i64: 1, 32>}, {pipeline_mode = #tpu.pipeline_mode<synchronous>, transform_indices = @transform_5, window_bounds = array<i64: 32, 128>}, {pipeline_mode = #tpu.pipeline_mode<synchronous>, transform_indices = @transform_6, window_bounds = array<i64: 1, 128>}, {transform_indices = @transform_7, window_bounds = array<i64: 16, 128>}]} {
    %c0 = arith.constant 0 : index
    %c0_0 = arith.constant 0 : index
    %0 = vector.load %arg1[%c0, %c0_0] : memref<16x32xf32, #tpu.memory_space<vmem>>, vector<16x32xf32>
    %1 = arith.truncf %0 : vector<16x32xf32> to vector<16x32xbf16>
    %c0_1 = arith.constant 0 : index
    %c0_2 = arith.constant 0 : index
    %2 = vector.load %arg2[%c0_1, %c0_2] : memref<32x32xbf16, #tpu.memory_space<vmem>>, vector<32x32xbf16>
    %cst = arith.constant dense<0.000000e+00> : vector<16x32xf32>
    %3 = tpu.matmul %1, %2, %cst {dimension_numbers = #tpu.dot_dimension_numbers<[1], [0], [0], [1], [0, 0, 1, 1], [], []>} : vector<16x32xbf16>, vector<32x32xbf16>, vector<16x32xf32> -> vector<16x32xf32>
    %c0_3 = arith.constant 0 : index
    %c0_4 = arith.constant 0 : index
    %4 = vector.load %arg3[%c0_3, %c0_4] : memref<1x32xf32, #tpu.memory_space<vmem>>, vector<1x32xf32>
    %5 = vector.broadcast %4 : vector<1x32xf32> to vector<16x32xf32>
    %6 = arith.addf %3, %5 : vector<16x32xf32>
    %7 = math.tanh %6 : vector<16x32xf32>
    %8 = arith.truncf %7 : vector<16x32xf32> to vector<16x32xbf16>
    %c0_5 = arith.constant 0 : index
    %c0_6 = arith.constant 0 : index
    %9 = vector.load %arg4[%c0_5, %c0_6] : memref<32x32xbf16, #tpu.memory_space<vmem>>, vector<32x32xbf16>
    %cst_7 = arith.constant dense<0.000000e+00> : vector<16x32xf32>
    %10 = tpu.matmul %8, %9, %cst_7 {dimension_numbers = #tpu.dot_dimension_numbers<[1], [0], [0], [1], [0, 0, 1, 1], [], []>} : vector<16x32xbf16>, vector<32x32xbf16>, vector<16x32xf32> -> vector<16x32xf32>
    %c0_8 = arith.constant 0 : index
    %c0_9 = arith.constant 0 : index
    %11 = vector.load %arg5[%c0_8, %c0_9] : memref<1x32xf32, #tpu.memory_space<vmem>>, vector<1x32xf32>
    %12 = vector.broadcast %11 : vector<1x32xf32> to vector<16x32xf32>
    %13 = arith.addf %10, %12 : vector<16x32xf32>
    %14 = math.tanh %13 : vector<16x32xf32>
    %15 = arith.truncf %14 : vector<16x32xf32> to vector<16x32xbf16>
    %c0_10 = arith.constant 0 : index
    %c0_11 = arith.constant 0 : index
    %16 = vector.load %arg6[%c0_10, %c0_11] : memref<32x128xbf16, #tpu.memory_space<vmem>>, vector<32x128xbf16>
    %cst_12 = arith.constant dense<0.000000e+00> : vector<16x128xf32>
    %17 = tpu.matmul %15, %16, %cst_12 {dimension_numbers = #tpu.dot_dimension_numbers<[1], [0], [0], [1], [0, 0, 1, 1], [], []>} : vector<16x32xbf16>, vector<32x128xbf16>, vector<16x128xf32> -> vector<16x128xf32>
    %c0_13 = arith.constant 0 : index
    %c0_14 = arith.constant 0 : index
    %18 = vector.load %arg7[%c0_13, %c0_14] : memref<1x128xf32, #tpu.memory_space<vmem>>, vector<1x128xf32>
    %19 = vector.broadcast %18 : vector<1x128xf32> to vector<16x128xf32>
    %20 = arith.addf %17, %19 : vector<16x128xf32>
    %cst_15 = arith.constant dense<0xFF800000> : vector<16xf32>
    %21 = vector.multi_reduction <maximumf>, %20, %cst_15 [1] : vector<16x128xf32> to vector<16xf32>
    %22 = vector.shape_cast %21 : vector<16xf32> to vector<16x1xf32>
    %23 = vector.broadcast %22 : vector<16x1xf32> to vector<16x128xf32>
    %24 = arith.subf %20, %23 : vector<16x128xf32>
    %25 = math.exp %24 : vector<16x128xf32>
    %cst_16 = arith.constant dense<0.000000e+00> : vector<16xf32>
    %26 = vector.multi_reduction <add>, %25, %cst_16 [1] : vector<16x128xf32> to vector<16xf32>
    %27 = vector.shape_cast %26 : vector<16xf32> to vector<16x1xf32>
    %28 = tpu.reciprocal %27 {approx = true} : vector<16x1xf32> -> vector<16x1xf32>
    %29 = vector.broadcast %28 : vector<16x1xf32> to vector<16x128xf32>
    %30 = arith.mulf %25, %29 : vector<16x128xf32>
    %31 = arith.truncf %30 : vector<16x128xf32> to vector<16x128xbf16>
    %c0_17 = arith.constant 0 : index
    %c0_18 = arith.constant 0 : index
    %32 = vector.load %arg8[%c0_17, %c0_18] : memref<16x128xbf16, #tpu.memory_space<vmem>>, vector<16x128xbf16>
    tpu.vector_store %arg8[%c0_17, %c0_18], %31 {strides = array<i32>} : memref<16x128xbf16, #tpu.memory_space<vmem>>, vector<16x128xbf16>,
    return
  }
  func.func @transform_0(%arg0: i32) -> (i32, i32) {
    %c0_i32 = arith.constant 0 : i32
    %c0_i32_0 = arith.constant 0 : i32
    return %arg0, %c0_i32 : i32, i32
  }
  func.func @transform_1(%arg0: i32) -> (i32, i32) {
    %c0_i32 = arith.constant 0 : i32
    %c0_i32_0 = arith.constant 0 : i32
    %c0_i32_1 = arith.constant 0 : i32
    return %c0_i32, %c0_i32_0 : i32, i32
  }
  func.func @transform_2(%arg0: i32) -> (i32, i32) {
    %c0_i32 = arith.constant 0 : i32
    %c0_i32_0 = arith.constant 0 : i32
    %c0_i32_1 = arith.constant 0 : i32
    return %c0_i32, %c0_i32_0 : i32, i32
  }
  func.func @transform_3(%arg0: i32) -> (i32, i32) {
    %c0_i32 = arith.constant 0 : i32
    %c0_i32_0 = arith.constant 0 : i32
    %c0_i32_1 = arith.constant 0 : i32
    return %c0_i32, %c0_i32_0 : i32, i32
  }
  func.func @transform_4(%arg0: i32) -> (i32, i32) {
    %c0_i32 = arith.constant 0 : i32
    %c0_i32_0 = arith.constant 0 : i32
    %c0_i32_1 = arith.constant 0 : i32
    return %c0_i32, %c0_i32_0 : i32, i32
  }
  func.func @transform_5(%arg0: i32) -> (i32, i32) {
    %c0_i32 = arith.constant 0 : i32
    %c0_i32_0 = arith.constant 0 : i32
    %c0_i32_1 = arith.constant 0 : i32
    return %c0_i32, %c0_i32_0 : i32, i32
  }
  func.func @transform_6(%arg0: i32) -> (i32, i32) {
    %c0_i32 = arith.constant 0 : i32
    %c0_i32_0 = arith.constant 0 : i32
    %c0_i32_1 = arith.constant 0 : i32
    return %c0_i32, %c0_i32_0 : i32, i32
  }
  func.func @transform_7(%arg0: i32) -> (i32, i32) {
    %c0_i32 = arith.constant 0 : i32
    %c0_i32_0 = arith.constant 0 : i32
    return %arg0, %c0_i32 : i32, i32
  }
}

</mosaic_0001>

<bundles_post_ra>
// kernel: tpu_custom_call.1
= control target key start
LH: loop header
LB: loop body
LE: loop exit
PB: predicated region body
PF: predicated region fallthrough
CT: control target
= control target key end

     0   :  { %12 = vsyncpa [#allocation3], 0  ;;  %s631_s0 = inlined_call_operand.hbm [shape: f32[16,32], index: 0, kind: input, shape index: {}]   ;;  %s632_s1 = inlined_call_operand.hbm [shape: bf16[32,32], index: 1, kind: input, shape index: {}]   ;;  %s633_s2 = inlined_call_operand.vmem [shape: f32[1,32], index: 2, kind: input, shape index: {}]   ;;  %s634_s3 = inlined_call_operand.hbm [shape: bf16[32,32], index: 3, kind: input, shape index: {}]   ;;  %s635_s4 = inlined_call_operand.vmem [shape: f32[1,32], index: 4, kind: input, shape index: {}]   ;;  %s636_s5 = inlined_call_operand.vmem [shape: bf16[32,128], index: 5, kind: input, shape index: {}]   ;;  %s637_s6 = inlined_call_operand.vmem [shape: f32[1,128], index: 6, kind: input, shape index: {}]   ;;  %s638_s7 = inlined_call_operand.hbm [shape: bf16[16,128], index: 7, kind: output, shape index: {}]  }
   0x1   :  { %13 = vsyncpa [#allocation6], 0 }
   0x2   :  { %14 = vsyncpa [#allocation4], 0  ;;  %s506_s24 = smov [#allocation5]   ;;  %s412_s28 = scalar_lea.hbm %s632_s1, 256 }
   0x3   :  { %s32_s25 = sshll.u32 %s506_s24, 4  ;;  %p413_p0 = scmp.ne.s32.totalorder %s632_s1, %s412_s28  ;;  %s33_s25 = int_to_ptr.vmem [resolvable:$true] %s32_s25 }
   0x4   :  { %p416_p1 = scmp.lt.u32.totalorder %s412_s28, %s632_s1 }
   0x6   :  { %p418_p2 = pnand %p416_p1, %p413_p0 }
   0x8   :  { %421 = shalt.err (!%p418_p2)
}
   0x9   :  { %s422_s10 = scalar_lea.vmem %s33_s25, 256  ;;  %p427_p4 = scmp.lt.s32.totalorder %s33_s25, %s33_s25 }
   0xa   :  { %p423_p3 = scmp.ne.s32.totalorder %s33_s25, %s422_s10  ;;  %p428_p5 = scmp.lt.s32.totalorder %s422_s10, %s422_s10 }
   0xc   :  { %p429_p6 = por %p428_p5, %p427_p4 }
   0xe   :  { %p430_p7 = pnand %p429_p6, %p423_p3 }
  0x10   :  { %433 = shalt.err (!%p430_p7)
}
  0x11   :  { %s507_s11 = smov 64   ;;  %s508_s12 = smov 4  }
  0x12   :  { %38 = dma.hbm_to_vmem [thread:$0]  %s632_s1, 256, %s33_s25, [#allocation6], %s507_s11, %s507_s11, %s508_s12  }
  0x13   :  { %s509_s15 = smov [#allocation2]   ;;  %s434_s19 = scalar_lea.hbm %s631_s0, 256 }
  0x14   :  { %s20_s16 = sshll.u32 %s509_s15, 4  ;;  %p435_p8 = scmp.ne.s32.totalorder %s631_s0, %s434_s19  ;;  %s21_s16 = int_to_ptr.vmem [resolvable:$true] %s20_s16 }
  0x15   :  { %p438_p9 = scmp.lt.u32.totalorder %s434_s19, %s631_s0 }
  0x17   :  { %p440_p10 = pnand %p438_p9, %p435_p8 }
  0x19   :  { %443 = shalt.err (!%p440_p10)
}
  0x1a   :  { %s444_s24 = scalar_lea.vmem %s21_s16, 256  ;;  %p449_p12 = scmp.lt.s32.totalorder %s21_s16, %s21_s16 }
  0x1b   :  { %p445_p11 = scmp.ne.s32.totalorder %s21_s16, %s444_s24  ;;  %p450_p13 = scmp.lt.s32.totalorder %s444_s24, %s444_s24 }
  0x1d   :  { %p451_p0 = por %p450_p13, %p449_p12 }
  0x1f   :  { %p452_p1 = pnand %p451_p0, %p445_p11 }
  0x21   :  { %455 = shalt.err (!%p452_p1)
}
  0x22   :  { %s510_s1 = smov 128   ;;  %s511_s25 = smov 8  }
  0x23   :  { %26 = dma.hbm_to_vmem [thread:$0]  %s631_s0, 256, %s21_s16, [#allocation3], %s510_s1, %s510_s1, %s511_s25  }
  0x24   :  { %s512_s28 = smov [#allocation7]   ;;  %s456_s9 = scalar_lea.hbm %s634_s3, 256 }
  0x25   :  { %s46_s29 = sshll.u32 %s512_s28, 4  ;;  %p457_p2 = scmp.ne.s32.totalorder %s634_s3, %s456_s9  ;;  %s47_s29 = int_to_ptr.vmem [resolvable:$true] %s46_s29 }
  0x26   :  { %p460_p3 = scmp.lt.u32.totalorder %s456_s9, %s634_s3 }
  0x28   :  { %p462_p4 = pnand %p460_p3, %p457_p2 }
  0x2a   :  { %465 = shalt.err (!%p462_p4)
}
  0x2b   :  { %s466_s17 = scalar_lea.vmem %s47_s29, 256  ;;  %p471_p6 = scmp.lt.s32.totalorder %s47_s29, %s47_s29 }
  0x2c   :  { %p467_p5 = scmp.ne.s32.totalorder %s47_s29, %s466_s17  ;;  %p472_p7 = scmp.lt.s32.totalorder %s466_s17, %s466_s17 }
  0x2e   :  { %p473_p8 = por %p472_p7, %p471_p6 }
  0x30   :  { %p474_p9 = pnand %p473_p8, %p467_p5 }
  0x32   :  { %477 = shalt.err (!%p474_p9)
}
  0x33   :  { %52 = dma.hbm_to_vmem [thread:$0]  %s634_s3, 256, %s47_s29, [#allocation6], %s507_s11, %s507_s11, %s508_s12  }
  0x34   :  { %500 = dma.done.wait [#allocation3], 256  }
  0x35   :  { %501 = vsyncadd [#allocation3], 4294967040 }
  0x36   :  { %502 = dma.done.wait [#allocation6], 512  }
  0x37   :  { %503 = vsyncadd [#allocation6], 4294966784  ;;  %v513_v0 = vmov 0.0   ;;  %vm514_vm0 = vmmov 0   ;;  %v390_v1 = vld [vmem:[#allocation5] sm:$0xff]   ;;  %v391_v2 = vld [vmem:[#allocation5 + $0x8] sm:$0xff]  }
  0x38   :  { %356 = vmatprep.subr.bf16.mxu0 %v513_v0  ;;  %360 = vmatprep.mubr.msk.bf16.mxu0 %vm514_vm0, %v513_v0  ;;  %v69_v3 = vld [vmem:[#allocation2] sm:$0xff]  ;;  %v70_v4 = vld [vmem:[#allocation2 + $0x8] sm:$0xff]  ;;  %vm95_vm1 = vcmask 261120  }
  0x39   :  { %364 = vmatprep.subr.bf16.mxu1 %v513_v0  ;;  %368 = vmatprep.mubr.msk.bf16.mxu1 %vm514_vm0, %v513_v0  ;;  %v71_v5 = vpack.c.bf16 %v70_v4, %v69_v3  ;;  %v392_v6 = vld [vmem:[#allocation7] sm:$0xff]   ;;  %v393_v7 = vld [vmem:[#allocation7 + $0x8] sm:$0xff]  }
  0x3a   :  { %357 = vmatpush3.bf16.msra.mxu0 %v390_v1  ;;  %365 = vmatpush3.bf16.msra.mxu1 %v392_v6  ;;  %v326_v8 = vld [vmem:[%s633_s2] ss:$0 sm:$0xff]  ;;  %v395_v19 = vld [vmem:[%s636_s5 + $0x8] sm:$0xff]  }
  0x3b   :  { %358 = vmatprep.subr.bf16.mxu0 %v513_v0  ;;  %366 = vmatprep.subr.bf16.mxu1 %v513_v0  ;;  %v394_v18 = vld [vmem:[%s636_s5] sm:$0xff]  }
  0x3c   :  { %v330_v20 = vld [vmem:[%s635_s4] ss:$0 sm:$0xff]  ;;  %s515_s4 = smov [#allocation8]  }
  0x3d   :  { %v334_v30 = vld [vmem:[%s637_s6] ss:$0 sm:$0xff]  ;;  %s313_s6 = sshll.u32 %s515_s4, 4  ;;  %s314_s6 = int_to_ptr.vmem [resolvable:$true] %s313_s6 }
  0x3e   :  { %359 = vmatpush3.bf16.msra.mxu0 %v391_v2  ;;  %367 = vmatpush3.bf16.msra.mxu1 %v393_v7  ;;  %s478_s1 = scalar_lea.vmem %s314_s6, 128  ;;  %p483_p11 = scmp.lt.s32.totalorder %s314_s6, %s314_s6 }
  0x3f   :  { %372 = vmatprep.subr.bf16.mxu0 %v513_v0  ;;  %p479_p10 = scmp.ne.s32.totalorder %s314_s6, %s478_s1  ;;  %p484_p12 = scmp.lt.s32.totalorder %s478_s1, %s478_s1 }
  0x41   :  { %361 = vmatmul.mubr.msk.bf16.vlgmr.msra.gmra.mrb[0].mxu0 %vm95_vm1, %v71_v5  ;;  %p485_p13 = por %p484_p12, %p483_p11 }
  0x42   :  { %376 = vmatprep.mubr.msk.bf16.mxu0 %vm514_vm0, %v513_v0  ;;  %373 = vmatpush3.bf16.msra.mxu0 %v394_v18 }
  0x43   :  { %374 = vmatprep.subr.bf16.mxu0 %v513_v0  ;;  %p486_p0 = pnand %p485_p13, %p479_p10 }
  0x46   :  { %375 = vmatpush3.bf16.msra.mxu0 %v395_v19 }
 0x114   :  { %v133_v9 = vpop.f32.mrb[0].mxu0 }
 0x115   :  { %v134_v10 = vadd.f32 %v326_v8, %v133_v9  ;;  %v362_v11 = vpop.f32.mrb[1].mxu0 }
 0x116   :  { %v136_v12 = vpop.f32.mrb[2].mxu0 }
 0x117   :  { %v137_v13 = vadd.f32 %v326_v8, %v136_v12  ;;  %v363_v14 = vpop.f32.mrb[3].mxu0  ;;  %396 = vtanh.f32 %v134_v10 }
 0x119   :  { %398 = vtanh.f32 %v137_v13 }
 0x121   :  { %v397_v15 = vpop.eup %396 }
 0x123   :  { %v399_v16 = vpop.eup %398 }
 0x124   :  { %v142_v17 = vpack.c.bf16 %v399_v16, %v397_v15 }
 0x126   :  { %369 = vmatmul.mubr.msk.bf16.vlgmr.msra.gmra.mrb[0].mxu1 %vm95_vm1, %v142_v17 }
 0x1f9   :  { %v203_v21 = vpop.f32.mrb[0].mxu1 }
 0x1fa   :  { %v204_v22 = vadd.f32 %v330_v20, %v203_v21  ;;  %v370_v23 = vpop.f32.mrb[1].mxu1 }
 0x1fb   :  { %v206_v24 = vpop.f32.mrb[2].mxu1 }
 0x1fc   :  { %v207_v25 = vadd.f32 %v330_v20, %v206_v24  ;;  %v371_v26 = vpop.f32.mrb[3].mxu1  ;;  %400 = vtanh.f32 %v204_v22 }
 0x1fe   :  { %402 = vtanh.f32 %v207_v25 }
 0x206   :  { %v401_v27 = vpop.eup %400 }
 0x208   :  { %v403_v28 = vpop.eup %402 }
 0x209   :  { %v212_v29 = vpack.c.bf16 %v403_v28, %v401_v27 }
 0x20b   :  { %377 = vmatmul.mubr.msk.bf16.vlgmr.msra.gmra.mrb[4].mxu0 %vm95_vm1, %v212_v29 }
 0x2de   :  { %v273_v31 = vpop.f32.mrb[4].mxu0 }
 0x2df   :  { %v274_v32 = vadd.f32 %v334_v30, %v273_v31  ;;  %v378_v33 = vpop.f32.mrb[5].mxu0 }
 0x2e0   :  { %v276_v34 = vpop.f32.mrb[6].mxu0 }
 0x2e1   :  { %280 = vmax.xlane.f32.xlu0 %v274_v32  ;;  %v379_v35 = vpop.f32.mrb[7].mxu0  ;;  %v277_v36 = vadd.f32 %v334_v30, %v276_v34 }
 0x2e5   :  { %282 = vmax.xlane.f32.xlu0 %v277_v36 }
 0x36e   :  { %v281_v37 = vpop.xlane.xlu0 %280 }
 0x36f   :  { %v284_v38 = vsub.f32 %v274_v32, %v281_v37 }
 0x371   :  { %v286_v39 = vmul.f32 1.442695, %v284_v38 }
 0x372   :  { %v283_v40 = vpop.xlane.xlu0 %282 }
 0x373   :  { %404 = vpow2.f32 %v286_v39  ;;  %v285_v41 = vsub.f32 %v277_v36, %v283_v40 }
 0x375   :  { %v288_v42 = vmul.f32 1.442695, %v285_v41 }
 0x377   :  { %406 = vpow2.f32 %v288_v42 }
 0x37d   :  { %v405_v43 = vpop.eup %404 }
 0x37e   :  { %290 = vadd.xlane.f32.xlu1 %v405_v43 }
 0x381   :  { %v407_v44 = vpop.eup %406 }
 0x382   :  { %292 = vadd.xlane.f32.xlu1 %v407_v44 }
 0x40b   :  { %v291_v45 = vpop.xlane.xlu1 %290 }
 0x40c   :  { %408 = vrcp.f32 %v291_v45 }
 0x40f   :  { %v293_v46 = vpop.xlane.xlu1 %292 }
 0x410   :  { %410 = vrcp.f32 %v293_v46 }
 0x416   :  { %v409_v47 = vpop.eup %408 }
 0x417   :  { %v296_v49 = vmul.f32 %v409_v47, %v405_v43 }
 0x41a   :  { %v411_v48 = vpop.eup %410 }
 0x41b   :  { %v297_v50 = vmul.f32 %v411_v48, %v407_v44 }
 0x41d   :  { %v345_v51 = vpack.c.bf16 %v297_v50, %v296_v49 }
 0x41f   :  { %346 = vst [vmem:[#allocation8] sm:$0xff] %v345_v51  }
 0x420   :  { %489 = shalt.err (!%p486_p0)
}
 0x421   :  { %s490_s27 = scalar_lea.hbm %s638_s7, 128 }
 0x422   :  { %p491_p1 = scmp.ne.s32.totalorder %s638_s7, %s490_s27  ;;  %p494_p2 = scmp.lt.u32.totalorder %s490_s27, %s638_s7 }
 0x424   :  { %p496_p3 = pnand %p494_p2, %p491_p1 }
 0x426   :  { %499 = shalt.err (!%p496_p3)
}
 0x427   :  { %319 = dma.vmem_to_hbm [thread:$0]  %s314_s6, 128, %s638_s7, [#allocation4], %s507_s11, %s507_s11, %s508_s12  }
 0x428   :  { %504 = dma.done.wait [#allocation4], 128  }
 0x429   :  { %505 = vsyncadd [#allocation4], 4294967168 }
 0x42a   :  { %323 = vsyncpa [#allocation3], 1 }
 0x42b   :  { %324 = vsyncpa [#allocation6], 1 }
 0x42c   :  { %325 = vsyncpa [#allocation4], 1 }

</bundles_post_ra>
